<compile_context>
chip_gen: v6e
topology: v6e:2x2x1
jax: 0.10.0
libtpu: 0.0.40
codegen_flags: <defaults>
</compile_context>

<pallas_src>
import functools

import jax
import jax.numpy as jnp
from jax.experimental import pallas as pl
from jax.experimental.pallas import tpu as pltpu


def _round_up(x, m):
    return ((x + m - 1) // m) * m


def _mlp_q(x_ref, w1_ref, b1_ref, w2_ref, b2_ref):
    """Shared fused body: linear -> ReLU -> linear (+bias), f32 accumulation."""
    x = x_ref[...]                                                    # [TB, S]
    h = jnp.dot(x, w1_ref[...], preferred_element_type=jnp.float32)
    h = jnp.maximum(h + b1_ref[...], 0.0)                             # ReLU (f32, VPU)
    q = jnp.dot(h.astype(w2_ref.dtype), w2_ref[...],
                preferred_element_type=jnp.float32)
    return q + b2_ref[...]                                            # [TB, A] f32


def _qnet_fwd_kernel(x_ref, w1_ref, b1_ref, w2_ref, b2_ref, q_ref):
    # Forward variant: only the (TB, A) Q tile is stored (no lane padding).
    q_ref[...] = _mlp_q(x_ref, w1_ref, b1_ref, w2_ref, b2_ref).astype(q_ref.dtype)


def _qnet_act_kernel(x_ref, w1_ref, b1_ref, w2_ref, b2_ref, a_ref):
    # Action variant: Q stays in VMEM; only the argmax column goes to HBM.
    q = _mlp_q(x_ref, w1_ref, b1_ref, w2_ref, b2_ref)                 # [TB, A]
    # First-index tie-break argmax (== jnp.argmax for finite q).
    # NOTE: if q contained NaN this would emit A (out of range) where jnp.argmax
    # returns 0; harmless for finite inputs.
    col = jax.lax.broadcasted_iota(jnp.int32, q.shape, dimension=1)
    qmax = jnp.max(q, axis=-1, keepdims=True)
    idx = jnp.where(q >= qmax, col, jnp.int32(q.shape[-1]))
    a_ref[...] = jnp.min(idx, axis=-1, keepdims=True).astype(jnp.int32)


def _qnet_call(states, w1, b1, w2, b2, *, tb, want_q, compute_dtype):
    B, S = states.shape
    H = w1.shape[1]
    A = w2.shape[1]

    # Param prep (cast / bias reshape) happens once outside the kernel; with
    # jit-baked weights it is constant-folded.
    w1c = w1.astype(compute_dtype)
    w2c = w2.astype(compute_dtype)
    b1r = b1.astype(jnp.float32).reshape(1, H)
    b2r = b2.astype(jnp.float32).reshape(1, A)
    x = states.astype(compute_dtype)

    # Batch tiling: pad only to a multiple of 8 sublanes, then derive the tile
    # from the tile COUNT so over-padding is at most (nt*8 - 1) rows.  Keep at
    # least 2 tiles (when B >= 16) so the "parallel" axis uses both v7x TCs.
    Bp8 = _round_up(B, 8)
    tb_cap = max(8, _round_up(tb, 8))
    nt = max(pl.cdiv(Bp8, tb_cap), 2 if Bp8 >= 16 else 1)
    tb_eff = _round_up(pl.cdiv(Bp8, nt), 8)
    Bp = nt * tb_eff
    if Bp != B:
        x = jnp.pad(x, ((0, Bp - B), (0, 0)))

    in_specs = [
        pl.BlockSpec((tb_eff, S), lambda i: (i, 0)),   # states: tiled over batch
        pl.BlockSpec((S, H), lambda i: (0, 0)),        # W1: VMEM-resident
        pl.BlockSpec((1, H), lambda i: (0, 0)),        # b1
        pl.BlockSpec((H, A), lambda i: (0, 0)),        # W2
        pl.BlockSpec((1, A), lambda i: (0, 0)),        # b2
    ]

    if want_q:
        kernel = _qnet_fwd_kernel
        out_shape = jax.ShapeDtypeStruct((Bp, A), jnp.float32)
        out_specs = pl.BlockSpec((tb_eff, A), lambda i: (i, 0))
    else:
        kernel = _qnet_act_kernel
        out_shape = jax.ShapeDtypeStruct((Bp, 1), jnp.int32)
        out_specs = pl.BlockSpec((tb_eff, 1), lambda i: (i, 0))

    out = pl.pallas_call(
        kernel,
        out_shape=out_shape,
        grid_spec=pl.GridSpec(
            grid=(nt,),
            in_specs=in_specs,
            out_specs=out_specs,
        ),
        compiler_params=pltpu.CompilerParams(
            dimension_semantics=("parallel",)),  # batch tiles -> both TCs on v7x
    )(x, w1c, b1r, w2c, b2r)
    return out, B


def qnet_forward(states, w1, b1, w2, b2, *, tb=2048, compute_dtype=jnp.float32):
    """states: [B, dim_state] -> Q-values: [B, dim_action] f32."""
    q, B = _qnet_call(states, w1, b1, w2, b2, tb=tb, want_q=True,
                      compute_dtype=compute_dtype)
    return q[:B]


def qnet_get_action(states, w1, b1, w2, b2, *, tb=2048, compute_dtype=jnp.float32):
    """Greedy action selection; argmax fused in-kernel, Q never hits HBM."""
    a, B = _qnet_call(states, w1, b1, w2, b2, tb=tb, want_q=False,
                      compute_dtype=compute_dtype)
    return a[:B, 0]


def _reference_forward(states, w1, b1, w2, b2):
    h = jnp.maximum(states @ w1 + b1, 0.0)
    return h @ w2 + b2


if __name__ == "__main__":
    # Dimensions implied by BaseQNet(dim_state, dim_action, dim_hidden=64).
    batch = 256
    dim_state = 32
    dim_hidden = 64
    dim_action = 8

    key = jax.random.PRNGKey(0)
    k_x, k_w1, k_b1, k_w2, k_b2 = jax.random.split(key, 5)

    states = jax.random.normal(k_x, (batch, dim_state), dtype=jnp.float32)
    w1 = jax.random.normal(k_w1, (dim_state, dim_hidden), jnp.float32) * (1.0 / dim_state ** 0.5)
    b1 = jax.random.normal(k_b1, (dim_hidden,), jnp.float32) * 0.01
    w2 = jax.random.normal(k_w2, (dim_hidden, dim_action), jnp.float32) * (1.0 / dim_hidden ** 0.5)
    b2 = jax.random.normal(k_b2, (dim_action,), jnp.float32) * 0.01

    # --- f32 path (bit-parity vs the f32 reference) ---
    forward = jax.jit(lambda s: qnet_forward(s, w1, b1, w2, b2))
    get_action = jax.jit(lambda s: qnet_get_action(s, w1, b1, w2, b2))

    q = forward(states)
    jax.block_until_ready(q)
    q_ref = _reference_forward(states, w1, b1, w2, b2)
    assert q.shape == (batch, dim_action)
    assert jnp.allclose(q, q_ref, atol=1e-5, rtol=1e-5), "Q mismatch vs reference"

    actions = get_action(states)
    jax.block_until_ready(actions)
    actions_ref = jnp.argmax(q_ref, axis=-1).astype(jnp.int32)
    assert actions.shape == (batch,)
    assert jnp.array_equal(actions, actions_ref), "argmax mismatch vs reference"

    # --- bf16 input/weight path (v6e/v7x recommendation), loose tolerance ---
    forward_bf16 = jax.jit(functools.partial(
        qnet_forward, w1=w1, b1=b1, w2=w2, b2=b2, compute_dtype=jnp.bfloat16))
    get_action_bf16 = jax.jit(functools.partial(
        qnet_get_action, w1=w1, b1=b1, w2=w2, b2=b2, compute_dtype=jnp.bfloat16))
    q_bf16 = forward_bf16(states)
    a_bf16 = get_action_bf16(states)
    jax.block_until_ready((q_bf16, a_bf16))
    assert q_bf16.shape == (batch, dim_action)
    assert jnp.allclose(q_bf16, q_ref, atol=5e-2, rtol=5e-2), "bf16 Q mismatch"
    assert a_bf16.shape == (batch,)
    assert bool(jnp.all((a_bf16 >= 0) & (a_bf16 < dim_action))), "bf16 action OOB"

    # Odd batch size: exercises the pad-to-8 / divisor-tile path (no 2x over-pad).
    states_odd = states[:201]
    q_odd = jax.jit(lambda s: qnet_forward(s, w1, b1, w2, b2))(states_odd)
    jax.block_until_ready(q_odd)
    assert q_odd.shape == (201, dim_action)
    assert jnp.allclose(q_odd, q_ref[:201], atol=1e-5, rtol=1e-5), "odd-B Q mismatch"

    print("KERNEL_OK")
</pallas_src>

<mosaic_0001>
module attributes {stable_mosaic.version = 11 : i64} {
  func.func @_qnet_fwd_kernel(%arg0: i32, %arg1: memref<128x32xf32, #tpu.memory_space<vmem>>, %arg2: memref<32x64xf32, #tpu.memory_space<vmem>>, %arg3: memref<1x64xf32, #tpu.memory_space<vmem>>, %arg4: memref<64x8xf32, #tpu.memory_space<vmem>>, %arg5: memref<1x8xf32, #tpu.memory_space<vmem>>, %arg6: memref<128x8xf32, #tpu.memory_space<vmem>>) attributes {dimension_semantics = [#tpu.dimension_semantics<parallel>], iteration_bounds = array<i64: 2>, scalar_prefetch = 0 : i64, scratch_operands = 0 : i64, tpu.core_type = #tpu.core_type<tc>, window_params = [{transform_indices = @transform_0, window_bounds = array<i64: 128, 32>}, {pipeline_mode = #tpu.pipeline_mode<synchronous>, transform_indices = @transform_1, window_bounds = array<i64: 32, 64>}, {pipeline_mode = #tpu.pipeline_mode<synchronous>, transform_indices = @transform_2, window_bounds = array<i64: 1, 64>}, {pipeline_mode = #tpu.pipeline_mode<synchronous>, transform_indices = @transform_3, window_bounds = array<i64: 64, 8>}, {pipeline_mode = #tpu.pipeline_mode<synchronous>, transform_indices = @transform_4, window_bounds = array<i64: 1, 8>}, {transform_indices = @transform_5, window_bounds = array<i64: 128, 8>}]} {
    %c0 = arith.constant 0 : index
    %c0_0 = arith.constant 0 : index
    %0 = vector.load %arg1[%c0, %c0_0] : memref<128x32xf32, #tpu.memory_space<vmem>>, vector<128x32xf32>
    %c0_1 = arith.constant 0 : index
    %c0_2 = arith.constant 0 : index
    %1 = vector.load %arg2[%c0_1, %c0_2] : memref<32x64xf32, #tpu.memory_space<vmem>>, vector<32x64xf32>
    %cst = arith.constant dense<0.000000e+00> : vector<128x64xf32>
    %2 = tpu.matmul %0, %1, %cst {dimension_numbers = #tpu.dot_dimension_numbers<[1], [0], [0], [1], [0, 0, 1, 1], [], []>} : vector<128x32xf32>, vector<32x64xf32>, vector<128x64xf32> -> vector<128x64xf32>
    %c0_3 = arith.constant 0 : index
    %c0_4 = arith.constant 0 : index
    %3 = vector.load %arg3[%c0_3, %c0_4] : memref<1x64xf32, #tpu.memory_space<vmem>>, vector<1x64xf32>
    %4 = vector.broadcast %3 : vector<1x64xf32> to vector<128x64xf32>
    %5 = arith.addf %2, %4 : vector<128x64xf32>
    %cst_5 = arith.constant 0.000000e+00 : f32
    %6 = vector.broadcast %cst_5 : f32 to vector<128x64xf32>
    %7 = arith.maximumf %5, %6 : vector<128x64xf32>
    %c0_6 = arith.constant 0 : index
    %c0_7 = arith.constant 0 : index
    %8 = vector.load %arg4[%c0_6, %c0_7] : memref<64x8xf32, #tpu.memory_space<vmem>>, vector<64x8xf32>
    %cst_8 = arith.constant dense<0.000000e+00> : vector<128x8xf32>
    %9 = tpu.matmul %7, %8, %cst_8 {dimension_numbers = #tpu.dot_dimension_numbers<[1], [0], [0], [1], [0, 0, 1, 1], [], []>} : vector<128x64xf32>, vector<64x8xf32>, vector<128x8xf32> -> vector<128x8xf32>
    %c0_9 = arith.constant 0 : index
    %c0_10 = arith.constant 0 : index
    %10 = vector.load %arg5[%c0_9, %c0_10] : memref<1x8xf32, #tpu.memory_space<vmem>>, vector<1x8xf32>
    %11 = vector.broadcast %10 : vector<1x8xf32> to vector<128x8xf32>
    %12 = arith.addf %9, %11 : vector<128x8xf32>
    %c0_11 = arith.constant 0 : index
    %c0_12 = arith.constant 0 : index
    %13 = vector.load %arg6[%c0_11, %c0_12] : memref<128x8xf32, #tpu.memory_space<vmem>>, vector<128x8xf32>
    tpu.vector_store %arg6[%c0_11, %c0_12], %12 {strides = array<i32>} : memref<128x8xf32, #tpu.memory_space<vmem>>, vector<128x8xf32>,
    return
  }
  func.func @transform_0(%arg0: i32) -> (i32, i32) {
    %c0_i32 = arith.constant 0 : i32
    %c0_i32_0 = arith.constant 0 : i32
    return %arg0, %c0_i32 : i32, i32
  }
  func.func @transform_1(%arg0: i32) -> (i32, i32) {
    %c0_i32 = arith.constant 0 : i32
    %c0_i32_0 = arith.constant 0 : i32
    %c0_i32_1 = arith.constant 0 : i32
    return %c0_i32, %c0_i32_0 : i32, i32
  }
  func.func @transform_2(%arg0: i32) -> (i32, i32) {
    %c0_i32 = arith.constant 0 : i32
    %c0_i32_0 = arith.constant 0 : i32
    %c0_i32_1 = arith.constant 0 : i32
    return %c0_i32, %c0_i32_0 : i32, i32
  }
  func.func @transform_3(%arg0: i32) -> (i32, i32) {
    %c0_i32 = arith.constant 0 : i32
    %c0_i32_0 = arith.constant 0 : i32
    %c0_i32_1 = arith.constant 0 : i32
    return %c0_i32, %c0_i32_0 : i32, i32
  }
  func.func @transform_4(%arg0: i32) -> (i32, i32) {
    %c0_i32 = arith.constant 0 : i32
    %c0_i32_0 = arith.constant 0 : i32
    %c0_i32_1 = arith.constant 0 : i32
    return %c0_i32, %c0_i32_0 : i32, i32
  }
  func.func @transform_5(%arg0: i32) -> (i32, i32) {
    %c0_i32 = arith.constant 0 : i32
    %c0_i32_0 = arith.constant 0 : i32
    return %arg0, %c0_i32 : i32, i32
  }
}

</mosaic_0001>

<bundles_post_ra>
// kernel: _lambda_.1
= control target key start
LH: loop header
LB: loop body
LE: loop exit
PB: predicated region body
PF: predicated region fallthrough
CT: control target
= control target key end

     0   :  { %s970_s18 = smov 0   ;;  %s1120_s0 = inlined_call_operand.vmem [shape: f32[256,32], index: 0, kind: input, shape index: {}]   ;;  %s1121_s1 = inlined_call_operand.vmem [shape: f32[32,64], index: 1, kind: input, shape index: {}]   ;;  %s1122_s2 = inlined_call_operand.vmem [shape: f32[1,64], index: 2, kind: input, shape index: {}]   ;;  %s1123_s3 = inlined_call_operand.vmem [shape: f32[64,8], index: 3, kind: input, shape index: {}]   ;;  %s1124_s4 = inlined_call_operand.vmem [shape: f32[1,8], index: 4, kind: input, shape index: {}]   ;;  %s1125_s5 = inlined_call_operand.vmem [shape: f32[256,8], index: 5, kind: output, shape index: {}]  }
   0x1 LB: > { %s747_s19 = sadd.s32 4294967295, %s938_s18   ;;  %p751_p0 = scmp.ge.s32.totalorder %s938_s18, 1  ;;  %s938_s18 = sphi %s970_s18, %s15_s18  }
   0x2   : > { %p188_p1 = scmp.lt.s32.totalorder %s938_s18, 3 }
   0x4   : > { %p189_p2 = pnand %p751_p0, %p188_p1 }
   0x5   : > { %s752_s24 = sshll.u32 (!%p189_p2), %s747_s19, 4 }
   0x6   : > { %192 = sbr.rel (%p189_p2) target bundleno = 446 (0x1be), region = 40  ;;  %p217_p3 = scmp.lt.s32.totalorder (!%p189_p2), %s752_s24, 31 }
   0xb   : > { %v247_v0 = vld [vmem:[%s1121_s1 + $0x18] sm:$0xff]  ;;  %v246_v1 = vld [vmem:[%s1121_s1 + $0x10] sm:$0xff]  ;;  %v245_v3 = vld [vmem:[%s1121_s1 + $0x8] sm:$0xff]  ;;  %s1127_s24 = smov (!%p217_p3, %s752_s24), 31  ;;  %vm255_vm0 = vcmask 261120   ;;  %vm480_vm1 = vcmask 523264  }
   0xc   : > { %836 = vmatprep.subr.mxu0 %v247_v0  ;;  %v472_v2 = vld [vmem:[%s1123_s3 + $0x38] sm:$0xff]  ;;  %v471_v4 = vld [vmem:[%s1123_s3 + $0x30] sm:$0xff]  ;;  %v244_v5 = vld [vmem:[%s1121_s1] sm:$0xff]  ;;  %s753_s8 = sshll.u32 %s1127_s24, 3  ;;  %vm674_vm2 = vcmask 64512  }
   0xd   : > { %837 = vmatpush3.msra.mxu0 %v247_v0  ;;  %908 = vmatprep.subr.mxu1 %v472_v2  ;;  %v470_v6 = vld [vmem:[%s1123_s3 + $0x28] sm:$0xff]  ;;  %s1007_s13 = scalar_lea.vmem %s1120_s0, %s753_s8  ;;  %v469_v11 = vld [vmem:[%s1123_s3 + $0x20] sm:$0xff]  ;;  %v468_v24 = vld [vmem:[%s1123_s3 + $0x18] sm:$0xff]  ;;  %s1083_s7 = scalar_lea.vmem %s1125_s5, %s753_s8 }
   0xe   : > { %838 = vmatprep.subr.mxu0 %v246_v1  ;;  %916 = vmatpush3.msra.mxu1 %v472_v2  ;;  %v228_v7 = vld [vmem:[%s1007_s13] sm:$0xff]  ;;  %v229_v8 = vld [vmem:[%s1007_s13 + $0x8] sm:$0xff]  ;;  %v230_v9 = vld [vmem:[%s1007_s13 + $0x10] sm:$0xff] }
   0xf   : > { %839 = vmatpush3.msra.mxu0 %v246_v1  ;;  %909 = vmatprep.subr.mxu1 %v471_v4  ;;  %v231_v10 = vld [vmem:[%s1007_s13 + $0x18] sm:$0xff]  ;;  %v232_v12 = vld [vmem:[%s1007_s13 + $0x20] sm:$0xff]  ;;  %v233_v13 = vld [vmem:[%s1007_s13 + $0x28] sm:$0xff] }
  0x10   : > { %840 = vmatprep.subr.mxu0 %v245_v3  ;;  %917 = vmatpush3.msra.mxu1 %v471_v4  ;;  %v234_v14 = vld [vmem:[%s1007_s13 + $0x30] sm:$0xff]  ;;  %v235_v15 = vld [vmem:[%s1007_s13 + $0x38] sm:$0xff]  ;;  %v236_v16 = vld [vmem:[%s1007_s13 + $0x40] sm:$0xff] }
  0x11   : > { %841 = vmatpush3.msra.mxu0 %v245_v3  ;;  %910 = vmatprep.subr.mxu1 %v470_v6  ;;  %v237_v17 = vld [vmem:[%s1007_s13 + $0x48] sm:$0xff]  ;;  %v238_v18 = vld [vmem:[%s1007_s13 + $0x50] sm:$0xff]  ;;  %v239_v19 = vld [vmem:[%s1007_s13 + $0x58] sm:$0xff] }
  0x12   : > { %842 = vmatprep.subr.mxu0 %v244_v5  ;;  %918 = vmatpush3.msra.mxu1 %v470_v6  ;;  %v240_v20 = vld [vmem:[%s1007_s13 + $0x60] sm:$0xff]  ;;  %v241_v21 = vld [vmem:[%s1007_s13 + $0x68] sm:$0xff]  ;;  %v242_v22 = vld [vmem:[%s1007_s13 + $0x70] sm:$0xff] }
  0x13   : > { %843 = vmatpush3.msra.mxu0 %v244_v5  ;;  %844 = vmatprep.mubr.msk.f32.mxu0 %vm255_vm0, %v228_v7  ;;  %v243_v23 = vld [vmem:[%s1007_s13 + $0x78] sm:$0xff]  ;;  %v467_v25 = vld [vmem:[%s1123_s3 + $0x10] sm:$0xff]  ;;  %v466_v26 = vld [vmem:[%s1123_s3 + $0x8] sm:$0xff] }
  0x14   : > { %845 = vmatmul.mubr.msk.f32.vlgmr.msra.gmra.mxu0 %vm255_vm0, %v229_v8  ;;  %868 = vmatprep.subr.mxu0 %v472_v2  ;;  %v465_v27 = vld [vmem:[%s1123_s3] sm:$0xff] }
  0x15   : > { %847 = vmatprep.mubr.msk.f32.mxu0 %vm255_vm0, %v230_v9  ;;  %869 = vmatpush3.msra.mxu0 %v472_v2  ;;  %v756_v28 = vld [vmem:[%s1122_s2] ss:$0 sm:$0xff] }
  0x16   : > { %870 = vmatprep.subr.mxu0 %v471_v4  ;;  %911 = vmatprep.subr.mxu1 %v469_v11 }
  0x17   : > { %871 = vmatpush3.msra.mxu0 %v471_v4  ;;  %919 = vmatpush3.msra.mxu1 %v469_v11 }
  0x18   : > { %848 = vmatmul.mubr.msk.f32.gmra.mxu0 %vm255_vm0, %v231_v10  ;;  %872 = vmatprep.subr.mxu0 %v470_v6 }
  0x19   : > { %850 = vmatprep.mubr.msk.f32.mxu0 %vm255_vm0, %v232_v12  ;;  %873 = vmatpush3.msra.mxu0 %v470_v6 }
  0x1a   : > { %874 = vmatprep.subr.mxu0 %v469_v11  ;;  %912 = vmatprep.subr.mxu1 %v468_v24 }
  0x1b   : > { %875 = vmatpush3.msra.mxu0 %v469_v11  ;;  %920 = vmatpush3.msra.mxu1 %v468_v24 }
  0x1c   : > { %851 = vmatmul.mubr.msk.f32.gmra.mxu0 %vm255_vm0, %v233_v13  ;;  %876 = vmatprep.subr.mxu0 %v468_v24  ;;  %v773_v13 = vld [vmem:[%s1124_s4] ss:$0 sm:$0xff] }
  0x1d   : > { %853 = vmatprep.mubr.msk.f32.mxu0 %vm255_vm0, %v234_v14  ;;  %877 = vmatpush3.msra.mxu0 %v468_v24 }
  0x1e   : > { %878 = vmatprep.subr.mxu0 %v467_v25  ;;  %913 = vmatprep.subr.mxu1 %v467_v25 }
  0x1f   : > { %879 = vmatpush3.msra.mxu0 %v467_v25  ;;  %921 = vmatpush3.msra.mxu1 %v467_v25 }
  0x20   : > { %854 = vmatmul.mubr.msk.f32.gmra.mxu0 %vm255_vm0, %v235_v15  ;;  %880 = vmatprep.subr.mxu0 %v466_v26 }
  0x21   : > { %856 = vmatprep.mubr.msk.f32.mxu0 %vm255_vm0, %v236_v16  ;;  %914 = vmatprep.subr.mxu1 %v466_v26 }
  0x22   : > { %881 = vmatpush3.msra.mxu0 %v466_v26  ;;  %922 = vmatpush3.msra.mxu1 %v466_v26 }
  0x23   : > { %882 = vmatprep.subr.mxu0 %v465_v27  ;;  %915 = vmatprep.subr.mxu1 %v465_v27 }
  0x24   : > { %857 = vmatmul.mubr.msk.f32.gmra.mxu0 %vm255_vm0, %v237_v17  ;;  %923 = vmatpush3.msra.mxu1 %v465_v27 }
  0x25   : > { %859 = vmatprep.mubr.msk.f32.mxu0 %vm255_vm0, %v238_v18  ;;  %883 = vmatpush3.msra.mxu0 %v465_v27 }
  0x28   : > { %860 = vmatmul.mubr.msk.f32.gmra.mxu0 %vm255_vm0, %v239_v19 }
  0x29   : > { %862 = vmatprep.mubr.msk.f32.mxu0 %vm255_vm0, %v240_v20 }
  0x2c   : > { %863 = vmatmul.mubr.msk.f32.gmra.mxu0 %vm255_vm0, %v241_v21 }
  0x2d   : > { %865 = vmatprep.mubr.msk.f32.mxu0 %vm255_vm0, %v242_v22 }
  0x30   : > { %866 = vmatmul.mubr.msk.f32.gmra.mxu0 %vm255_vm0, %v243_v23 }
  0xd4   : > { %v846_v29 = vpop.f32.mrf.mxu0 }
  0xd5   : > { %v376_v30 = vadd.f32 %v846_v29, %v756_v28 }
  0xd6   : > { %v370_v31 = vpop.f32.mrf.mxu0 }
  0xd7   : > { %v371_v32 = vadd.f32 %v756_v28, %v370_v31  ;;  %v450_v35 = vmax.f32 %v376_v30, 0.0 }
  0xd8   : > { %v849_v33 = vpop.f32.mrf.mxu0 }
  0xd9   : > { %v449_v34 = vmax.f32 %v371_v32, 0.0  ;;  %v386_v36 = vadd.f32 %v849_v33, %v756_v28 }
  0xda   : > { %v380_v37 = vpop.f32.mrf.mxu0 }
  0xdb   : > { %v381_v38 = vadd.f32 %v756_v28, %v380_v37  ;;  %884 = vmatprep.mubr.msk.f32.mxu0 %vm480_vm1, %v449_v34  ;;  %v452_v41 = vmax.f32 %v386_v36, 0.0 }
  0xdc   : > { %v852_v39 = vpop.f32.mrf.mxu0  ;;  %885 = vmatmul.mubr.msk.f32.vlgmr.msra.gmra.mxu0 %vm480_vm1, %v450_v35 }
  0xdd   : > { %v451_v40 = vmax.f32 %v381_v38, 0.0  ;;  %v396_v42 = vadd.f32 %v852_v39, %v756_v28 }
  0xde   : > { %v390_v43 = vpop.f32.mrf.mxu0 }
  0xdf   : > { %v391_v44 = vadd.f32 %v756_v28, %v390_v43  ;;  %887 = vmatprep.mubr.msk.f32.mxu1 %vm480_vm1, %v451_v40  ;;  %v454_v47 = vmax.f32 %v396_v42, 0.0 }
  0xe0   : > { %v855_v45 = vpop.f32.mrf.mxu0  ;;  %888 = vmatmul.mubr.msk.f32.vlgmr.msra.gmra.mxu1 %vm480_vm1, %v452_v41 }
  0xe1   : > { %v453_v46 = vmax.f32 %v391_v44, 0.0  ;;  %v406_v48 = vadd.f32 %v855_v45, %v756_v28 }
  0xe2   : > { %v400_v49 = vpop.f32.mrf.mxu0 }
  0xe3   : > { %v401_v50 = vadd.f32 %v756_v28, %v400_v49  ;;  %890 = vmatprep.mubr.msk.f32.mxu1 %vm480_vm1, %v453_v46  ;;  %v456_v53 = vmax.f32 %v406_v48, 0.0 }
  0xe4   : > { %v858_v51 = vpop.f32.mrf.mxu0  ;;  %891 = vmatmul.mubr.msk.f32.gmra.mxu1 %vm480_vm1, %v454_v47 }
  0xe5   : > { %v455_v52 = vmax.f32 %v401_v50, 0.0  ;;  %v416_v54 = vadd.f32 %v858_v51, %v756_v28 }
  0xe6   : > { %v410_v55 = vpop.f32.mrf.mxu0 }
  0xe7   : > { %v411_v56 = vadd.f32 %v756_v28, %v410_v55  ;;  %893 = vmatprep.mubr.msk.f32.mxu1 %vm480_vm1, %v455_v52  ;;  %v458_v59 = vmax.f32 %v416_v54, 0.0 }
  0xe8   : > { %v861_v57 = vpop.f32.mrf.mxu0  ;;  %894 = vmatmul.mubr.msk.f32.gmra.mxu1 %vm480_vm1, %v456_v53 }
  0xe9   : > { %v457_v58 = vmax.f32 %v411_v56, 0.0  ;;  %v426_v60 = vadd.f32 %v861_v57, %v756_v28 }
  0xea   : > { %v420_v61 = vpop.f32.mrf.mxu0 }
  0xeb   : > { %v421_v62 = vadd.f32 %v756_v28, %v420_v61  ;;  %896 = vmatprep.mubr.msk.f32.mxu1 %vm480_vm1, %v457_v58  ;;  %v460_v1 = vmax.f32 %v426_v60, 0.0 }
  0xec   : > { %v864_v63 = vpop.f32.mrf.mxu0  ;;  %897 = vmatmul.mubr.msk.f32.gmra.mxu1 %vm480_vm1, %v458_v59 }
  0xed   : > { %v459_v0 = vmax.f32 %v421_v62, 0.0  ;;  %v436_v2 = vadd.f32 %v864_v63, %v756_v28 }
  0xee   : > { %v430_v3 = vpop.f32.mrf.mxu0 }
  0xef   : > { %v431_v4 = vadd.f32 %v756_v28, %v430_v3  ;;  %899 = vmatprep.mubr.msk.f32.mxu1 %vm480_vm1, %v459_v0  ;;  %v462_v7 = vmax.f32 %v436_v2, 0.0 }
  0xf0   : > { %v867_v5 = vpop.f32.mrf.mxu0  ;;  %900 = vmatmul.mubr.msk.f32.gmra.mxu1 %vm480_vm1, %v460_v1 }
  0xf1   : > { %v461_v6 = vmax.f32 %v431_v4, 0.0  ;;  %v446_v8 = vadd.f32 %v867_v5, %v756_v28 }
  0xf2   : > { %v440_v9 = vpop.f32.mrf.mxu0 }
  0xf3   : > { %v441_v10 = vadd.f32 %v756_v28, %v440_v9  ;;  %902 = vmatprep.mubr.msk.f32.mxu1 %vm480_vm1, %v461_v6  ;;  %v464_v12 = vmax.f32 %v446_v8, 0.0 }
  0xf4   : > { %903 = vmatmul.mubr.msk.f32.gmra.mxu1 %vm480_vm1, %v462_v7 }
  0xf5   : > { %v463_v11 = vmax.f32 %v441_v10, 0.0 }
  0xf7   : > { %905 = vmatprep.mubr.msk.f32.mxu1 %vm480_vm1, %v463_v11 }
  0xf8   : > { %906 = vmatmul.mubr.msk.f32.gmra.mxu1 %vm480_vm1, %v464_v12 }
 0x19c   : > { %v886_v14 = vpop.f32.mrf.mxu0 }
 0x19d   : > { %v601_v15 = vadd.f32 %v886_v14, %v773_v13 }
 0x19e   : > { %v595_v16 = vpop.f32.mrf.mxu0 }
 0x19f   : > { %676 = vst.msk [vmem:[%s1083_s7 + $0x8] sm:$0xff] %vm674_vm2, %v601_v15  ;;  %v596_v17 = vadd.f32 %v773_v13, %v595_v16 }
 0x1a0   : > { %v889_v18 = vpop.f32.mrf.mxu1 }
 0x1a1   : > { %675 = vst.msk [vmem:[%s1083_s7] sm:$0xff] %vm674_vm2, %v596_v17  ;;  %v611_v19 = vadd.f32 %v889_v18, %v773_v13 }
 0x1a2   : > { %v605_v20 = vpop.f32.mrf.mxu1 }
 0x1a3   : > { %678 = vst.msk [vmem:[%s1083_s7 + $0x18] sm:$0xff] %vm674_vm2, %v611_v19  ;;  %v606_v21 = vadd.f32 %v773_v13, %v605_v20 }
 0x1a4   : > { %v892_v22 = vpop.f32.mrf.mxu1 }
 0x1a5   : > { %677 = vst.msk [vmem:[%s1083_s7 + $0x10] sm:$0xff] %vm674_vm2, %v606_v21  ;;  %v621_v23 = vadd.f32 %v892_v22, %v773_v13 }
 0x1a6   : > { %v615_v24 = vpop.f32.mrf.mxu1 }
 0x1a7   : > { %680 = vst.msk [vmem:[%s1083_s7 + $0x28] sm:$0xff] %vm674_vm2, %v621_v23  ;;  %v616_v25 = vadd.f32 %v773_v13, %v615_v24 }
 0x1a8   : > { %v895_v26 = vpop.f32.mrf.mxu1 }
 0x1a9   : > { %679 = vst.msk [vmem:[%s1083_s7 + $0x20] sm:$0xff] %vm674_vm2, %v616_v25  ;;  %v631_v27 = vadd.f32 %v895_v26, %v773_v13 }
 0x1aa   : > { %v625_v28 = vpop.f32.mrf.mxu1 }
 0x1ab   : > { %682 = vst.msk [vmem:[%s1083_s7 + $0x38] sm:$0xff] %vm674_vm2, %v631_v27  ;;  %v626_v29 = vadd.f32 %v773_v13, %v625_v28 }
 0x1ac   : > { %v898_v30 = vpop.f32.mrf.mxu1 }
 0x1ad   : > { %681 = vst.msk [vmem:[%s1083_s7 + $0x30] sm:$0xff] %vm674_vm2, %v626_v29  ;;  %v641_v31 = vadd.f32 %v898_v30, %v773_v13 }
 0x1ae   : > { %v635_v32 = vpop.f32.mrf.mxu1 }
 0x1af   : > { %684 = vst.msk [vmem:[%s1083_s7 + $0x48] sm:$0xff] %vm674_vm2, %v641_v31  ;;  %v636_v33 = vadd.f32 %v773_v13, %v635_v32 }
 0x1b0   : > { %v901_v34 = vpop.f32.mrf.mxu1 }
 0x1b1   : > { %683 = vst.msk [vmem:[%s1083_s7 + $0x40] sm:$0xff] %vm674_vm2, %v636_v33  ;;  %v651_v35 = vadd.f32 %v901_v34, %v773_v13 }
 0x1b2   : > { %v645_v36 = vpop.f32.mrf.mxu1 }
 0x1b3   : > { %686 = vst.msk [vmem:[%s1083_s7 + $0x58] sm:$0xff] %vm674_vm2, %v651_v35  ;;  %v646_v37 = vadd.f32 %v773_v13, %v645_v36 }
 0x1b4   : > { %v904_v38 = vpop.f32.mrf.mxu1 }
 0x1b5   : > { %685 = vst.msk [vmem:[%s1083_s7 + $0x50] sm:$0xff] %vm674_vm2, %v646_v37  ;;  %v661_v39 = vadd.f32 %v904_v38, %v773_v13 }
 0x1b6   : > { %v655_v40 = vpop.f32.mrf.mxu1 }
 0x1b7   : > { %688 = vst.msk [vmem:[%s1083_s7 + $0x68] sm:$0xff] %vm674_vm2, %v661_v39  ;;  %v656_v41 = vadd.f32 %v773_v13, %v655_v40 }
 0x1b8   : > { %v907_v42 = vpop.f32.mrf.mxu1 }
 0x1b9   : > { %687 = vst.msk [vmem:[%s1083_s7 + $0x60] sm:$0xff] %vm674_vm2, %v656_v41  ;;  %v671_v43 = vadd.f32 %v907_v42, %v773_v13 }
 0x1ba   : > { %v665_v44 = vpop.f32.mrf.mxu1 }
 0x1bb   : > { %690 = vst.msk [vmem:[%s1083_s7 + $0x78] sm:$0xff] %vm674_vm2, %v671_v43  ;;  %v666_v45 = vadd.f32 %v773_v13, %v665_v44 }
 0x1bd   : > { %689 = vst.msk [vmem:[%s1083_s7 + $0x70] sm:$0xff] %vm674_vm2, %v666_v45 }
 0x1be PF: > { %s15_s18 = sadd.s32 1, %s938_s18  }
 0x1bf   : > { %p12_p4 = scmp.ge.s32.totalorder %s15_s18, 4  }
 0x1c1   :  { %14 = sbr.rel (!%p12_p4) target bundleno = 1 (0x1), region = 70 }

</bundles_post_ra>
